<compile_context>
chip_gen: v5e
topology: v5e:2x2
jax: 0.10.0
libtpu: 0.0.40
codegen_flags: <defaults>
</compile_context>

<pallas_src>
import functools

import jax
import jax.numpy as jnp
from jax.experimental import pallas as pl
from jax.experimental.pallas import tpu as pltpu


_PAD_BIAS = 1e9  # added to ||p_hat||^2 of padded class columns -> exp(-(...)) == 0


def _round_up(x, m):
    return (x + m - 1) // m * m


def proxynca_kernel(x_ref, pt_ref, pn2_ref, y_ref, loss_ref,
                    m_sc, s_sc, dpos_sc, *, tile_c):
    j = pl.program_id(1)  # class-tile index (reduction axis, innermost)

    @pl.when(j == 0)
    def _init():
        m_sc[...] = jnp.full_like(m_sc, -jnp.inf)
        s_sc[...] = jnp.zeros_like(s_sc)
        dpos_sc[...] = jnp.zeros_like(dpos_sc)

    # e(i, c) = d(i, c) - ||x_i||^2 = ||p_hat_c||^2 - 2 x_i . p_hat_c
    # The -2 is folded into pt; ||x||^2 cancels in the final loss and is never formed.
    xp = jnp.dot(x_ref[...], pt_ref[...],
                 preferred_element_type=jnp.float32)          # (TB, TC) on the MXU
    e = xp + pn2_ref[...]                                     # (TB, TC) f32

    col = jax.lax.broadcasted_iota(jnp.int32, e.shape, 1) + j * tile_c
    is_pos = col == y_ref[...]                                # (TB, TC)

    # Positive-class term (zero contribution if this C tile doesn't hold the label).
    dpos_sc[...] += jnp.sum(jnp.where(is_pos, e, 0.0), axis=1, keepdims=True)

    # Online (streaming) logsumexp over the negative classes of (-e).
    # Padded class columns carry +_PAD_BIAS in pn2 -> their exp() is exactly 0.
    z = jnp.where(is_pos, -jnp.inf, -e)
    m_new = jnp.maximum(m_sc[...], jnp.max(z, axis=1, keepdims=True))
    s_sc[...] = (s_sc[...] * jnp.exp(m_sc[...] - m_new)
                 + jnp.sum(jnp.exp(z - m_new), axis=1, keepdims=True))
    m_sc[...] = m_new

    @pl.when(j == pl.num_programs(1) - 1)
    def _finalize():
        lse_neg = m_sc[...] + jnp.log(s_sc[...])              # logsumexp_neg(-d) + ||x||^2
        loss_ref[...] = (dpos_sc[...] + lse_neg).astype(loss_ref.dtype)


def proxy_nca_loss(xs, ys, proxies, *, tile_b=256, tile_c=2048):
    """Mean ProxyNCA loss. xs: (B, D) embeddings, ys: (B,) int labels,
    proxies: (C, D) proxy table (one row per class).

    Pass bf16 `xs` to run the distance matmul in bf16 at MXU peak (the proxy
    operand is cast to xs.dtype); validate numerics against an f32 reference
    with a loosened tolerance if you do.
    """
    B, D = xs.shape
    C, D2 = proxies.shape
    assert D2 == D
    assert C >= 2, "ProxyNCA needs at least one negative class (C >= 2)"

    # ---- grid-invariant proxy preprocessing, hoisted out of the kernel (XLA) ----
    p32 = proxies.astype(jnp.float32)
    inv_norm = 1.0 / jnp.maximum(
        jnp.sqrt(jnp.sum(p32 * p32, axis=1, keepdims=True)), 1e-12)
    p_hat = p32 * inv_norm                       # F.normalize(proxies, dim=1)
    pn2 = jnp.sum(p_hat * p_hat, axis=1)         # exact (==1 unless ||proxy|| < 1e-12)
    pt = (-2.0 * p_hat).T.astype(xs.dtype)       # (D, C): pre-transposed, -2 folded in

    # ---- padding / tiling ----
    Dp = _round_up(D, 128)                       # lane-dense contraction dim
    lane = 256 if C >= 256 else 128              # v6e/v7x MXU is 256 wide (128 on v5e)
    TC = min(_round_up(tile_c, lane), _round_up(C, lane))
    Cp = _round_up(C, TC)

    TB = min(tile_b, _round_up(B, 8))
    # v7x megacore: give the "parallel" batch axis >= 2 grid steps when B allows.
    if B > 8 and _round_up(B, TB) // TB < 2:
        TB = _round_up((B + 1) // 2, 8)
    Bp = _round_up(B, TB)

    x_p = jnp.pad(xs, ((0, Bp - B), (0, Dp - D)))
    pt_p = jnp.pad(pt, ((0, Dp - D), (0, Cp - C)))
    pn2_row = jnp.where(jnp.arange(Cp) < C,
                        jnp.pad(pn2, (0, Cp - C)),
                        _PAD_BIAS).astype(jnp.float32).reshape(1, Cp)
    y_p = jnp.pad(ys.astype(jnp.int32).reshape(B, 1), ((0, Bp - B), (0, 0)))

    nb, nc = Bp // TB, Cp // TC

    # Explicit VMEM budgeting: double-buffered input tiles + f32 intermediates,
    # raised above the v5e 16 MiB scoped default, clamped under v7x's 64 MiB.
    itemsize = x_p.dtype.itemsize
    vmem_est = 2 * (TB * Dp + Dp * TC) * itemsize + 6 * TB * TC * 4
    vmem_limit = int(min(max(2 * vmem_est, 32 * 2**20), 48 * 2**20))

    per_sample = pl.pallas_call(
        functools.partial(proxynca_kernel, tile_c=TC),
        out_shape=jax.ShapeDtypeStruct((Bp, 1), jnp.float32),
        grid_spec=pltpu.PrefetchScalarGridSpec(
            num_scalar_prefetch=0,
            grid=(nb, nc),
            in_specs=[
                pl.BlockSpec((TB, Dp), lambda i, j: (i, 0)),   # x tile (C-invariant)
                pl.BlockSpec((Dp, TC), lambda i, j: (0, j)),   # -2 * p_hat^T tile
                pl.BlockSpec((1, TC), lambda i, j: (0, j)),    # ||p_hat||^2 (+pad bias)
                pl.BlockSpec((TB, 1), lambda i, j: (i, 0)),    # labels
            ],
            out_specs=pl.BlockSpec((TB, 1), lambda i, j: (i, 0)),
            scratch_shapes=[pltpu.VMEM((TB, 1), jnp.float32)] * 3,  # m, s, d_pos
        ),
        compiler_params=pltpu.CompilerParams(
            dimension_semantics=("parallel", "arbitrary"),
            vmem_limit_bytes=vmem_limit,
        ),
    )(x_p, pt_p, pn2_row, y_p)

    # Tiny final mean over the real batch rows (padded rows discarded).
    return jnp.mean(per_sample[:B, 0])


if __name__ == "__main__":
    # Module hyper-params (small, deterministic).
    sz_batch = 8
    sz_embed = 32
    nb_classes = 16

    key = jax.random.PRNGKey(0)
    k_proxy, k_x, k_y = jax.random.split(key, 3)

    # Xavier-uniform init for the (nb_classes, sz_embed) proxy embedding.
    bound = (6.0 / (sz_embed + nb_classes)) ** 0.5
    proxies = jax.random.uniform(
        k_proxy, (nb_classes, sz_embed), jnp.float32, minval=-bound, maxval=bound)

    xs = jax.random.normal(k_x, (sz_batch, sz_embed), jnp.float32)
    ys = jax.random.randint(k_y, (sz_batch,), 0, nb_classes, jnp.int32)

    loss = proxy_nca_loss(xs, ys, proxies)
    jax.block_until_ready(loss)

    # Pure-JAX reference (naive exp-ratio form, mirroring the PyTorch module).
    p_hat = proxies / jnp.maximum(
        jnp.linalg.norm(proxies, axis=1, keepdims=True), 1e-12)
    diff = p_hat[None, :, :] - xs[:, None, :] + 1e-16
    d = jnp.sum(diff * diff, axis=2)
    onehot = jax.nn.one_hot(ys, nb_classes, dtype=jnp.float32)
    p_dist = jnp.sum(jnp.exp(-d) * onehot, axis=1)
    n_sum = jnp.sum(jnp.exp(-d) * (1.0 - onehot), axis=1)
    ref = jnp.mean(-jnp.log(p_dist / n_sum))

    assert jnp.allclose(loss, ref, rtol=1e-4, atol=1e-4), (loss, ref)
    print("KERNEL_OK")
</pallas_src>

<mosaic_0001>
module attributes {stable_mosaic.version = 11 : i64} {
  func.func @proxynca_kernel(%arg0: i32, %arg1: i32, %arg2: memref<8x128xf32, #tpu.memory_space<vmem>>, %arg3: memref<128x128xf32, #tpu.memory_space<vmem>>, %arg4: memref<1x128xf32, #tpu.memory_space<vmem>>, %arg5: memref<8x1xi32, #tpu.memory_space<vmem>>, %arg6: memref<8x1xf32, #tpu.memory_space<vmem>>, %arg7: memref<8x1xf32, #tpu.memory_space<vmem>>, %arg8: memref<8x1xf32, #tpu.memory_space<vmem>>, %arg9: memref<8x1xf32, #tpu.memory_space<vmem>>) attributes {dimension_semantics = [#tpu.dimension_semantics<parallel>, #tpu.dimension_semantics<arbitrary>], iteration_bounds = array<i64: 1, 1>, scalar_prefetch = 0 : i64, scratch_operands = 3 : i64, tpu.core_type = #tpu.core_type<tc>, window_params = [{transform_indices = @transform_0, window_bounds = array<i64: 8, 128>}, {transform_indices = @transform_1, window_bounds = array<i64: 128, 128>}, {transform_indices = @transform_2, window_bounds = array<i64: 1, 128>}, {transform_indices = @transform_3, window_bounds = array<i64: 8, 1>}, {transform_indices = @transform_4, window_bounds = array<i64: 8, 1>}]} {
    %c0_i32 = arith.constant 0 : i32
    %0 = arith.cmpi eq, %arg1, %c0_i32 : i32
    %1 = arith.extui %0 : i1 to i32
    %c0_i32_0 = arith.constant 0 : i32
    %2 = arith.cmpi ne, %1, %c0_i32_0 : i32
    scf.if %2 {
      %cst_30 = arith.constant 0xFF800000 : f32
      %47 = vector.broadcast %cst_30 : f32 to vector<8x1xf32>
      %c0_31 = arith.constant 0 : index
      %c0_32 = arith.constant 0 : index
      %48 = vector.load %arg7[%c0_31, %c0_32] : memref<8x1xf32, #tpu.memory_space<vmem>>, vector<8x1xf32>
      tpu.vector_store %arg7[%c0_31, %c0_32], %47 {strides = array<i32>} : memref<8x1xf32, #tpu.memory_space<vmem>>, vector<8x1xf32>,
      %cst_33 = arith.constant 0.000000e+00 : f32
      %49 = vector.broadcast %cst_33 : f32 to vector<8x1xf32>
      %c0_34 = arith.constant 0 : index
      %c0_35 = arith.constant 0 : index
      %50 = vector.load %arg8[%c0_34, %c0_35] : memref<8x1xf32, #tpu.memory_space<vmem>>, vector<8x1xf32>
      tpu.vector_store %arg8[%c0_34, %c0_35], %49 {strides = array<i32>} : memref<8x1xf32, #tpu.memory_space<vmem>>, vector<8x1xf32>,
      %cst_36 = arith.constant 0.000000e+00 : f32
      %51 = vector.broadcast %cst_36 : f32 to vector<8x1xf32>
      %c0_37 = arith.constant 0 : index
      %c0_38 = arith.constant 0 : index
      %52 = vector.load %arg9[%c0_37, %c0_38] : memref<8x1xf32, #tpu.memory_space<vmem>>, vector<8x1xf32>
      tpu.vector_store %arg9[%c0_37, %c0_38], %51 {strides = array<i32>} : memref<8x1xf32, #tpu.memory_space<vmem>>, vector<8x1xf32>,
    } else {
    }
    %c0 = arith.constant 0 : index
    %c0_1 = arith.constant 0 : index
    %3 = vector.load %arg2[%c0, %c0_1] : memref<8x128xf32, #tpu.memory_space<vmem>>, vector<8x128xf32>
    %c0_2 = arith.constant 0 : index
    %c0_3 = arith.constant 0 : index
    %4 = vector.load %arg3[%c0_2, %c0_3] : memref<128x128xf32, #tpu.memory_space<vmem>>, vector<128x128xf32>
    %cst = arith.constant dense<0.000000e+00> : vector<8x128xf32>
    %5 = tpu.matmul %3, %4, %cst {dimension_numbers = #tpu.dot_dimension_numbers<[1], [0], [0], [1], [0, 0, 1, 1], [], []>} : vector<8x128xf32>, vector<128x128xf32>, vector<8x128xf32> -> vector<8x128xf32>
    %c0_4 = arith.constant 0 : index
    %c0_5 = arith.constant 0 : index
    %6 = vector.load %arg4[%c0_4, %c0_5] : memref<1x128xf32, #tpu.memory_space<vmem>>, vector<1x128xf32>
    %7 = vector.broadcast %6 : vector<1x128xf32> to vector<8x128xf32>
    %8 = arith.addf %5, %7 : vector<8x128xf32>
    %9 = tpu.iota {dimensions = array<i32: 1>} : vector<8x128xi32>
    %c128_i32 = arith.constant 128 : i32
    %10 = arith.muli %arg1, %c128_i32 : i32
    %11 = vector.broadcast %10 : i32 to vector<8x128xi32>
    %12 = arith.addi %9, %11 : vector<8x128xi32>
    %c0_6 = arith.constant 0 : index
    %c0_7 = arith.constant 0 : index
    %13 = vector.load %arg5[%c0_6, %c0_7] : memref<8x1xi32, #tpu.memory_space<vmem>>, vector<8x1xi32>
    %14 = vector.broadcast %13 : vector<8x1xi32> to vector<8x128xi32>
    %15 = arith.cmpi eq, %12, %14 : vector<8x128xi32>
    %c0_8 = arith.constant 0 : index
    %c0_9 = arith.constant 0 : index
    %16 = vector.load %arg9[%c0_8, %c0_9] : memref<8x1xf32, #tpu.memory_space<vmem>>, vector<8x1xf32>
    %cst_10 = arith.constant 0.000000e+00 : f32
    %17 = vector.broadcast %cst_10 : f32 to vector<8x128xf32>
    %18 = arith.select %15, %8, %17 : vector<8x128xi1>, vector<8x128xf32>
    %cst_11 = arith.constant dense<0.000000e+00> : vector<8xf32>
    %19 = vector.multi_reduction <add>, %18, %cst_11 [1] : vector<8x128xf32> to vector<8xf32>
    %20 = vector.shape_cast %19 : vector<8xf32> to vector<8x1xf32>
    %21 = arith.addf %16, %20 : vector<8x1xf32>
    %c0_12 = arith.constant 0 : index
    %c0_13 = arith.constant 0 : index
    %22 = vector.load %arg9[%c0_12, %c0_13] : memref<8x1xf32, #tpu.memory_space<vmem>>, vector<8x1xf32>
    tpu.vector_store %arg9[%c0_12, %c0_13], %21 {strides = array<i32>} : memref<8x1xf32, #tpu.memory_space<vmem>>, vector<8x1xf32>,
    %cst_14 = arith.constant 0.000000e+00 : f32
    %23 = vector.broadcast %cst_14 : f32 to vector<8x128xf32>
    %24 = arith.subf %23, %8 : vector<8x128xf32>
    %cst_15 = arith.constant 0xFF800000 : f32
    %25 = vector.broadcast %cst_15 : f32 to vector<8x128xf32>
    %26 = arith.select %15, %25, %24 : vector<8x128xi1>, vector<8x128xf32>
    %c0_16 = arith.constant 0 : index
    %c0_17 = arith.constant 0 : index
    %27 = vector.load %arg7[%c0_16, %c0_17] : memref<8x1xf32, #tpu.memory_space<vmem>>, vector<8x1xf32>
    %cst_18 = arith.constant dense<0xFF800000> : vector<8xf32>
    %28 = vector.multi_reduction <maximumf>, %26, %cst_18 [1] : vector<8x128xf32> to vector<8xf32>
    %29 = vector.shape_cast %28 : vector<8xf32> to vector<8x1xf32>
    %30 = arith.maximumf %27, %29 : vector<8x1xf32>
    %c0_19 = arith.constant 0 : index
    %c0_20 = arith.constant 0 : index
    %31 = vector.load %arg8[%c0_19, %c0_20] : memref<8x1xf32, #tpu.memory_space<vmem>>, vector<8x1xf32>
    %c0_21 = arith.constant 0 : index
    %c0_22 = arith.constant 0 : index
    %32 = vector.load %arg7[%c0_21, %c0_22] : memref<8x1xf32, #tpu.memory_space<vmem>>, vector<8x1xf32>
    %33 = arith.subf %32, %30 : vector<8x1xf32>
    %34 = math.exp %33 : vector<8x1xf32>
    %35 = arith.mulf %31, %34 : vector<8x1xf32>
    %36 = vector.broadcast %30 : vector<8x1xf32> to vector<8x128xf32>
    %37 = arith.subf %26, %36 : vector<8x128xf32>
    %38 = math.exp %37 : vector<8x128xf32>
    %cst_23 = arith.constant dense<0.000000e+00> : vector<8xf32>
    %39 = vector.multi_reduction <add>, %38, %cst_23 [1] : vector<8x128xf32> to vector<8xf32>
    %40 = vector.shape_cast %39 : vector<8xf32> to vector<8x1xf32>
    %41 = arith.addf %35, %40 : vector<8x1xf32>
    %c0_24 = arith.constant 0 : index
    %c0_25 = arith.constant 0 : index
    %42 = vector.load %arg8[%c0_24, %c0_25] : memref<8x1xf32, #tpu.memory_space<vmem>>, vector<8x1xf32>
    tpu.vector_store %arg8[%c0_24, %c0_25], %41 {strides = array<i32>} : memref<8x1xf32, #tpu.memory_space<vmem>>, vector<8x1xf32>,
    %c0_26 = arith.constant 0 : index
    %c0_27 = arith.constant 0 : index
    %43 = vector.load %arg7[%c0_26, %c0_27] : memref<8x1xf32, #tpu.memory_space<vmem>>, vector<8x1xf32>
    tpu.vector_store %arg7[%c0_26, %c0_27], %30 {strides = array<i32>} : memref<8x1xf32, #tpu.memory_space<vmem>>, vector<8x1xf32>,
    %c0_i32_28 = arith.constant 0 : i32
    %44 = arith.cmpi eq, %arg1, %c0_i32_28 : i32
    %45 = arith.extui %44 : i1 to i32
    %c0_i32_29 = arith.constant 0 : i32
    %46 = arith.cmpi ne, %45, %c0_i32_29 : i32
    scf.if %46 {
      %c0_30 = arith.constant 0 : index
      %c0_31 = arith.constant 0 : index
      %47 = vector.load %arg7[%c0_30, %c0_31] : memref<8x1xf32, #tpu.memory_space<vmem>>, vector<8x1xf32>
      %c0_32 = arith.constant 0 : index
      %c0_33 = arith.constant 0 : index
      %48 = vector.load %arg8[%c0_32, %c0_33] : memref<8x1xf32, #tpu.memory_space<vmem>>, vector<8x1xf32>
      %49 = math.log %48 : vector<8x1xf32>
      %50 = arith.addf %47, %49 : vector<8x1xf32>
      %c0_34 = arith.constant 0 : index
      %c0_35 = arith.constant 0 : index
      %51 = vector.load %arg9[%c0_34, %c0_35] : memref<8x1xf32, #tpu.memory_space<vmem>>, vector<8x1xf32>
      %52 = arith.addf %51, %50 : vector<8x1xf32>
      %c0_36 = arith.constant 0 : index
      %c0_37 = arith.constant 0 : index
      %53 = vector.load %arg6[%c0_36, %c0_37] : memref<8x1xf32, #tpu.memory_space<vmem>>, vector<8x1xf32>
      tpu.vector_store %arg6[%c0_36, %c0_37], %52 {strides = array<i32>} : memref<8x1xf32, #tpu.memory_space<vmem>>, vector<8x1xf32>,
    } else {
    }
    return
  }
  func.func @transform_0(%arg0: i32, %arg1: i32) -> (i32, i32) {
    %c0_i32 = arith.constant 0 : i32
    %c0_i32_0 = arith.constant 0 : i32
    return %arg0, %c0_i32 : i32, i32
  }
  func.func @transform_1(%arg0: i32, %arg1: i32) -> (i32, i32) {
    %c0_i32 = arith.constant 0 : i32
    %c0_i32_0 = arith.constant 0 : i32
    return %c0_i32, %arg1 : i32, i32
  }
  func.func @transform_2(%arg0: i32, %arg1: i32) -> (i32, i32) {
    %c0_i32 = arith.constant 0 : i32
    %c0_i32_0 = arith.constant 0 : i32
    return %c0_i32, %arg1 : i32, i32
  }
  func.func @transform_3(%arg0: i32, %arg1: i32) -> (i32, i32) {
    %c0_i32 = arith.constant 0 : i32
    %c0_i32_0 = arith.constant 0 : i32
    return %arg0, %c0_i32 : i32, i32
  }
  func.func @transform_4(%arg0: i32, %arg1: i32) -> (i32, i32) {
    %c0_i32 = arith.constant 0 : i32
    %c0_i32_0 = arith.constant 0 : i32
    return %arg0, %c0_i32 : i32, i32
  }
}

</mosaic_0001>

<bundles_post_ra>
// kernel: tpu_custom_call.1
= control target key start
LH: loop header
LB: loop body
LE: loop exit
PB: predicated region body
PF: predicated region fallthrough
CT: control target
= control target key end

     0   :  { %9 = vsyncpa [#allocation6], 0  ;;  %s180_s18 = smov [#allocation5]   ;;  %s181_s20 = smov 128   ;;  %s233_s0 = inlined_call_operand.vmem [shape: f32[8,128], index: 0, kind: input, shape index: {}]   ;;  %s234_s1 = inlined_call_operand.hbm [shape: f32[128,128], index: 1, kind: input, shape index: {}]   ;;  %s235_s2 = inlined_call_operand.vmem [shape: f32[1,128], index: 2, kind: input, shape index: {}]   ;;  %s236_s3 = inlined_call_operand.vmem [shape: s32[8,1], index: 3, kind: input, shape index: {}]   ;;  %s237_s4 = inlined_call_operand.vmem [shape: f32[8,1], index: 4, kind: output, shape index: {}]  }
   0x1   :  { %s16_s17 = sshll.u32 %s234_s1, 4  ;;  %s18_s19 = sshll.u32 %s180_s18, 4  ;;  %s17_s17 = int_to_ptr.hbm [resolvable:$true] %s16_s17  ;;  %s19_s19 = int_to_ptr.vmem [resolvable:$true] %s18_s19 }
   0x2   :  { %s182_s21 = smov 8  }
   0x3   :  { %24 = dma.hbm_to_vmem [thread:$0]  %s17_s17, 2048, %s19_s19, [#allocation6], %s181_s20, %s181_s20, %s182_s21  }
   0x4   :  { %178 = dma.done.wait [#allocation6], 2048  }
   0x5   :  { %179 = vsyncadd [#allocation6], 4294965248  ;;  %v57_v0 = vld [vmem:[#allocation5 + $0x78] sm:$0xff]  ;;  %v56_v1 = vld [vmem:[#allocation5 + $0x70] sm:$0xff]  ;;  %v183_v2 = vmov 0   ;;  %vm37_vm0 = vcmask 7168   ;;  %v82_v20 = vlaneseq }
   0x6   :  { %62 = vmatpush.msra.mxu0 %v57_v0  ;;  %145 = vset.pattern.permute.xlu0 %v183_v2  ;;  %v55_v3 = vld [vmem:[#allocation5 + $0x68] sm:$0xff]  ;;  %v54_v4 = vld [vmem:[#allocation5 + $0x60] sm:$0xff]  ;;  %v53_v6 = vld [vmem:[#allocation5 + $0x58] sm:$0xff]  ;;  %v184_v19 = vmov 0.0   ;;  %v185_v29 = vmov -inf  }
   0x7   :  { %146 = vset.pattern.permute.xlu1 %v183_v2  ;;  %v87_v5 = vld [vmem:[%s236_s3] sm:$0xff]  ;;  %v52_v7 = vld [vmem:[#allocation5 + $0x50] sm:$0xff]  ;;  %v50_v9 = vld [vmem:[#allocation5 + $0x40] sm:$0xff]  ;;  %40 = vst.msk [vmem:[#allocation4] sm:$0xff] %vm37_vm0, %v184_v19  ;;  %v83_v21 = vand.u32 127, %v82_v20 }
   0x8   :  { %63 = vmatpush.msra.mxu0 %v56_v1  ;;  %89 = vperm.xlu0 %145, %v87_v5   ;;  %v51_v8 = vld [vmem:[#allocation5 + $0x48] sm:$0xff]  ;;  %v49_v10 = vld [vmem:[#allocation5 + $0x38] sm:$0xff]  ;;  %v48_v11 = vld [vmem:[#allocation5 + $0x30] sm:$0xff]  ;;  %39 = vst.msk [vmem:[#allocation3] sm:$0xff] %vm37_vm0, %v184_v19 }
   0x9   :  { %v47_v12 = vld [vmem:[#allocation5 + $0x28] sm:$0xff]  ;;  %v46_v13 = vld [vmem:[#allocation5 + $0x20] sm:$0xff]  ;;  %v45_v14 = vld [vmem:[#allocation5 + $0x18] sm:$0xff]  ;;  %38 = vst.msk [vmem:[#allocation2] sm:$0xff] %vm37_vm0, %v185_v29 }
   0xa   :  { %64 = vmatpush.msra.mxu0 %v55_v3  ;;  %v44_v15 = vld [vmem:[#allocation5 + $0x10] sm:$0xff]  ;;  %v43_v16 = vld [vmem:[#allocation5 + $0x8] sm:$0xff]  ;;  %v42_v17 = vld [vmem:[#allocation5] sm:$0xff] }
   0xb   :  { %v41_v18 = vld [vmem:[%s233_s0] sm:$0xff] }
   0xc   :  { %65 = vmatpush.msra.mxu0 %v54_v4  ;;  %v147_v22 = vld [vmem:[%s235_s2] ss:$0 sm:$0xff] }
   0xe   :  { %66 = vmatpush.msra.mxu0 %v53_v6  ;;  %v92_v30 = vld [vmem:[#allocation4] sm:$0xff] }
   0xf   :  { %v105_v43 = vld [vmem:[#allocation3] sm:$0xff] }
  0x10   :  { %67 = vmatpush.msra.mxu0 %v52_v7  ;;  %v101_v32 = vld [vmem:[#allocation2] sm:$0xff] }
  0x12   :  { %68 = vmatpush.msra.mxu0 %v51_v8 }
  0x14   :  { %69 = vmatpush.msra.mxu0 %v50_v9 }
  0x16   :  { %70 = vmatpush.msra.mxu0 %v49_v10 }
  0x18   :  { %71 = vmatpush.msra.mxu0 %v48_v11 }
  0x1a   :  { %72 = vmatpush.msra.mxu0 %v47_v12 }
  0x1c   :  { %73 = vmatpush.msra.mxu0 %v46_v13 }
  0x1e   :  { %74 = vmatpush.msra.mxu0 %v45_v14 }
  0x20   :  { %75 = vmatpush.msra.mxu0 %v44_v15 }
  0x22   :  { %76 = vmatpush.msra.mxu0 %v43_v16 }
  0x24   :  { %77 = vmatpush.msra.mxu0 %v42_v17 }
  0x25   :  { %78 = vmatmul.f32.vlgmr.msra.gmra.mxu0 %v41_v18 }
  0x7a   :  { %v90_v23 = vpop.permute.xlu0 %89 }
  0x7b   :  { %vm91_vm1 = vcmp.eq.s32.totalorder %v83_v21, %v90_v23 }
  0xa2   :  { %v79_v24 = vpop.f32.mrf.mxu0 }
  0xa3   :  { %v80_v25 = vadd.f32 %v147_v22, %v79_v24 }
  0xa5   :  { %v93_v26 = vsel %vm91_vm1, %v80_v25, 0.0  ;;  %v99_v27 = vsub.f32 0.0, %v80_v25 }
  0xa6   :  { %94 = vadd.xlane.f32.xlu2 %v93_v26 }
  0xa7   :  { %v100_v28 = vsel %vm91_vm1, -inf, %v99_v27 }
  0xa8   :  { %102 = vmax.xlane.f32.xlu0 %v100_v28 }
 0x119   :  { %v95_v31 = vpop.xlane.xlu2 %94 }
 0x11a   :  { %v96_v33 = vadd.f32 %v95_v31, %v92_v30 }
 0x11b   :  { %v103_v34 = vpop.xlane.xlu0 %102 }
 0x11c   :  { %98 = vst.msk [vmem:[#allocation4] sm:$0xff] %vm37_vm0, %v96_v33  ;;  %v104_v35 = vmax.f32 %v101_v32, %v103_v34 }
 0x11e   :  { %v106_v36 = vsub.f32 %v101_v32, %v104_v35  ;;  %122 = vst.msk [vmem:[#allocation2] sm:$0xff] %vm37_vm0, %v104_v35  ;;  %112 = vperm.xlu1 %146, %v104_v35  }
 0x120   :  { %v107_v41 = vmul.f32 1.442695, %v106_v36 }
 0x123   :  { %v131_v52 = vld [vmem:[#allocation4] sm:$0xff] }
 0x125   :  { %v126_v50 = vld [vmem:[#allocation2] sm:$0xff] }
 0x190   :  { %v113_v37 = vpop.permute.xlu1 %112 }
 0x191   :  { %v115_v38 = vsub.f32 %v100_v28, %v113_v37 }
 0x193   :  { %v116_v39 = vmul.f32 1.442695, %v115_v38 }
 0x195   :  { %148 = vpow2.f32 %v116_v39 }
 0x196   :  { %150 = vpow2.f32 %v107_v41 }
 0x19b   :  { %v149_v40 = vpop.eup %148 }
 0x19c   :  { %118 = vadd.xlane.f32.xlu1 %v149_v40  ;;  %v151_v42 = vpop.eup %150 }
 0x19d   :  { %v109_v44 = vmul.f32 %v151_v42, %v105_v43 }
 0x20f   :  { %v119_v45 = vpop.xlane.xlu1 %118 }
 0x210   :  { %v120_v46 = vadd.f32 %v119_v45, %v109_v44 }
 0x212   :  { %121 = vst.msk [vmem:[#allocation3] sm:$0xff] %vm37_vm0, %v120_v46 }
 0x219   :  { %v127_v47 = vld [vmem:[#allocation3] sm:$0xff] }
 0x21a   :  { %152 = vlog2.f32 %v127_v47 }
 0x220   :  { %v153_v48 = vpop.eup %152 }
 0x221   :  { %v129_v49 = vmul.f32 0.6931472, %v153_v48 }
 0x223   :  { %v130_v51 = vadd.f32 %v129_v49, %v126_v50 }
 0x225   :  { %v132_v53 = vadd.f32 %v131_v52, %v130_v51 }
 0x227   :  { %133 = vst.msk [vmem:[%s237_s4] sm:$0xff] %vm37_vm0, %v132_v53 }
 0x228   :  { %138 = vsyncpa [#allocation6], 1 }

</bundles_post_ra>
